<compile_context>
chip_gen: v6e
topology: v6e:2x2x1
jax: 0.10.0
libtpu: 0.0.40
codegen_flags: <defaults>
</compile_context>

<pallas_src>
import numpy as np
import jax
import jax.numpy as jnp
from jax import lax
from jax.experimental import pallas as pl
from jax.experimental.pallas import tpu as pltpu


def _round_up(x, m):
    return ((x + m - 1) // m) * m


# ----------------------------------------------------------------------------
# Fused kernel: audio_head projection + masked cross-entropy accumulation.
#   grid = (NC cores, T tiles per core, K tiles)
#   emb_ref  : [TM, TK]   bf16  merged embeddings tile
#   tgt_ref  : [TM, 1]    int32 effective shifted targets (-100 / OOR ignored)
#   w_ref    : [TK, V2]   bf16  audio_head.weight^T block (resident if n_k==1)
#   b_ref    : [1, V2]    f32   audio_head.bias
#   loss/cnt out : [1,8,128] f32 per-core partial sums (broadcast lane-dense)
#   logit_acc: [TM, V2]   f32   matmul accumulator
#   loss_acc / cnt_acc : [1,1] f32 per-core running sums
# ----------------------------------------------------------------------------
def fused_head_ce_kernel(emb_ref, tgt_ref, w_ref, b_ref,
                         loss_out_ref, cnt_out_ref,
                         logit_acc, loss_acc, cnt_acc):
    i = pl.program_id(1)            # T-tile index within this core's chunk
    k = pl.program_id(2)            # K(=hidden) tile index
    nt = pl.num_programs(1)
    nk = pl.num_programs(2)

    @pl.when((i == 0) & (k == 0))
    def _():
        loss_acc[...] = jnp.zeros_like(loss_acc)
        cnt_acc[...] = jnp.zeros_like(cnt_acc)

    @pl.when(k == 0)
    def _():
        logit_acc[...] = jnp.zeros_like(logit_acc)

    # MXU matmul: bf16 x bf16, f32 accumulation.
    logit_acc[...] += jnp.dot(emb_ref[...], w_ref[...],
                              preferred_element_type=jnp.float32)

    @pl.when(k == nk - 1)
    def _():
        logits = logit_acc[...] + b_ref[...]                    # [TM, V2] f32
        tgt = tgt_ref[...]                                      # [TM, 1] i32
        tm, v2 = logits.shape

        row_max = jnp.max(logits, axis=-1, keepdims=True)                    # XLU
        sumexp = jnp.sum(jnp.exp(logits - row_max), axis=-1, keepdims=True)  # EUP
        col = lax.broadcasted_iota(jnp.int32, (tm, v2), 1)
        picked = jnp.sum(jnp.where(col == tgt, logits, 0.0),
                         axis=-1, keepdims=True)                # logits[tgt]
        # -100 (ignore), padding, and out-of-range (>=V2) targets all dropped.
        valid = (tgt >= 0) & (tgt < v2)
        per_tok = jnp.where(valid, row_max + jnp.log(sumexp) - picked, 0.0)

        loss_acc[...] += jnp.sum(per_tok, axis=0, keepdims=True)
        cnt_acc[...] += jnp.sum(valid.astype(jnp.float32), axis=0, keepdims=True)

    @pl.when((i == nt - 1) & (k == nk - 1))
    def _():
        # Per-core partial sums broadcast into a lane-dense (1,8,128) block.
        loss_out_ref[...] = jnp.zeros(loss_out_ref.shape, jnp.float32) + loss_acc[...]
        cnt_out_ref[...] = jnp.zeros(cnt_out_ref.shape, jnp.float32) + cnt_acc[...]


# ----------------------------------------------------------------------------
# VMEM capacity / tile selection
# ----------------------------------------------------------------------------
def _vmem_capacity_bytes():
    try:
        return int(pltpu.get_tpu_info().vmem_capacity_bytes)
    except Exception:
        return 64 * 1024 * 1024          # conservative default (v7x per-core)


def _choose_tiles(T, H, V2, vmem_cap):
    w_bytes = H * V2 * 2                                  # bf16 weight
    resident = w_bytes <= int(0.35 * vmem_cap)
    if resident:
        TK, H_pad = H, H
        w_vmem = w_bytes                                  # single-buffered
    else:
        TK = 512
        H_pad = _round_up(H, TK)
        w_vmem = 2 * TK * V2 * 2                          # streamed, double-buffered

    budget = int(0.55 * vmem_cap)

    def need(tm):
        emb = 2 * tm * TK * 2                             # double-buffered bf16 tiles
        tgt = 2 * tm * 4
        acc = tm * V2 * 4                                 # logits accumulator
        tmp = 3 * tm * V2 * 4                             # CE f32/i32 temporaries
        return emb + tgt + acc + tmp + w_vmem + V2 * 4 + (2 << 20)

    if T < 256:
        TM = max(16, _round_up(T, 16))                    # bf16 sublane tile = 16
    else:
        TM = 256
        for cand in (1024, 512):
            if T >= cand and need(cand) <= budget:
                TM = cand
                break
    return TM, TK, H_pad, need(TM)


# ----------------------------------------------------------------------------
# One-time param prep (hoists the bf16 casts out of the per-step forward).
# ----------------------------------------------------------------------------
def prepare_params(params):
    return {
        "lm_embed": params["lm_embed"].astype(jnp.bfloat16),
        "audio_embed": params["audio_embed"].astype(jnp.bfloat16),
        "audio_head_w": params["audio_head_w"].astype(jnp.bfloat16),
        "audio_head_b": params["audio_head_b"].astype(jnp.float32),
    }


# ----------------------------------------------------------------------------
# Wrapper: SeparateHeadModel.forward
# ----------------------------------------------------------------------------
def separate_head_forward(input_ids, labels, prepared, audio_code_offset):
    B, S = input_ids.shape
    T = B * S
    H = prepared["lm_embed"].shape[1]
    V2 = prepared["audio_head_w"].shape[1]

    flat_ids = input_ids.reshape(T).astype(jnp.int32)
    flat_labels = labels.reshape(T).astype(jnp.int32)
    audio_mask = flat_ids >= audio_code_offset

    # --- effective shifted target: label of the NEXT audio token (flattened
    # over (B,S), exactly like the PyTorch boolean-mask compaction + shift) ---
    lab_val = flat_labels - audio_code_offset
    lab_val = jnp.where(lab_val < 0, -100, lab_val).astype(jnp.int32)
    pos = jnp.arange(T, dtype=jnp.int32)
    audio_pos = jnp.where(audio_mask, pos, T)                       # T == "+inf"
    nearest_ge = lax.cummin(audio_pos, axis=0, reverse=True)        # min audio pos >= t
    next_pos = jnp.concatenate([nearest_ge[1:], jnp.full((1,), T, jnp.int32)])
    lab_ext = jnp.concatenate([lab_val, jnp.full((1,), -100, jnp.int32)])
    eff_target = jnp.where(audio_mask, lab_ext[next_pos], -100).astype(jnp.int32)

    # --- tiling ---------------------------------------------------------------
    vmem_cap = _vmem_capacity_bytes()
    TM, TK, H_pad, vmem_need = _choose_tiles(T, H, V2, vmem_cap)
    n_t = pl.cdiv(T, TM)
    NC = 2 if n_t >= 2 else 1          # split the T reduction across TensorCores
    n_t = _round_up(n_t, NC)
    T_pad = n_t * TM
    n_per_core = n_t // NC
    n_k = H_pad // TK

    # --- pad only the cheap O(T) arrays (never the [T,H] activations) ---------
    pad = T_pad - T
    if pad:
        flat_ids = jnp.pad(flat_ids, (0, pad))
        audio_mask = jnp.pad(audio_mask, (0, pad))
        eff_target = jnp.pad(eff_target, (0, pad), constant_values=-100)

    # --- merged embeddings: two O(T*H) gathers + select (no table concat) -----
    lm_idx = jnp.where(audio_mask, 0, flat_ids)
    au_idx = jnp.where(audio_mask, flat_ids - audio_code_offset, 0)
    merged = jnp.where(audio_mask[:, None],
                       jnp.take(prepared["audio_embed"], au_idx, axis=0),
                       jnp.take(prepared["lm_embed"], lm_idx, axis=0))  # [T_pad,H] bf16
    # TODO(synk): the HF backbone (self.lm_model.model) would transform `merged` here.
    if H_pad != H:
        merged = jnp.pad(merged, ((0, 0), (0, H_pad - H)))

    w = prepared["audio_head_w"]
    if H_pad != H:
        w = jnp.pad(w, ((0, H_pad - H), (0, 0)))
    b = prepared["audio_head_b"].reshape(1, V2)

    grid = (NC, n_per_core, n_k)
    vmem_limit = int(min(max(vmem_need + (8 << 20), 32 << 20), int(0.85 * vmem_cap)))

    def build(single_buffer_resident):
        res_kw = {"pipeline_mode": pl.Buffered(1)} if single_buffer_resident else {}
        w_kw = res_kw if n_k == 1 else {}          # resident weight only if not K-tiled
        emb_spec = pl.BlockSpec((TM, TK), lambda c, i, k: (c * n_per_core + i, k))
        tgt_spec = pl.BlockSpec((TM, 1), lambda c, i, k: (c * n_per_core + i, 0))
        w_spec = pl.BlockSpec((TK, V2), lambda c, i, k: (k, 0), **w_kw)
        b_spec = pl.BlockSpec((1, V2), lambda c, i, k: (0, 0), **res_kw)
        out_spec = pl.BlockSpec((1, 8, 128), lambda c, i, k: (c, 0, 0))
        return pl.pallas_call(
            fused_head_ce_kernel,
            out_shape=(jax.ShapeDtypeStruct((NC, 8, 128), jnp.float32),
                       jax.ShapeDtypeStruct((NC, 8, 128), jnp.float32)),
            grid_spec=pltpu.PrefetchScalarGridSpec(
                num_scalar_prefetch=0,
                grid=grid,
                in_specs=[emb_spec, tgt_spec, w_spec, b_spec],
                out_specs=(out_spec, out_spec),
                scratch_shapes=[pltpu.VMEM((TM, V2), jnp.float32),
                                pltpu.VMEM((1, 1), jnp.float32),
                                pltpu.VMEM((1, 1), jnp.float32)],
            ),
            compiler_params=pltpu.CompilerParams(
                dimension_semantics=("parallel", "arbitrary", "arbitrary"),
                vmem_limit_bytes=vmem_limit,
            ),
            cost_estimate=pl.CostEstimate(
                flops=2 * T_pad * H_pad * V2,
                transcendentals=T_pad * V2,
                bytes_accessed=(T_pad * H_pad * 2 + T_pad * 4
                                + (1 if n_k == 1 else n_t) * H_pad * V2 * 2
                                + V2 * 4 + 2 * NC * 8 * 128 * 4),
            ),
        )

    args = (merged, eff_target[:, None], w, b)
    try:
        part_loss, part_cnt = build(True)(*args)
    except Exception:
        # Fallback if this Pallas build rejects pl.Buffered(1) for resident specs.
        part_loss, part_cnt = build(False)(*args)

    loss_sum = jnp.sum(part_loss[:, 0, 0])
    cnt = jnp.sum(part_cnt[:, 0, 0])
    return loss_sum / jnp.maximum(cnt, 1.0)          # guard count == 0


# ----------------------------------------------------------------------------
# Pure-numpy reference (mirrors the PyTorch code exactly, incl. masked gather)
# ----------------------------------------------------------------------------
def reference_loss(input_ids, labels, params, offset):
    ids = np.asarray(input_ids).reshape(-1)
    lab = np.asarray(labels).reshape(-1)
    mask = ids >= offset
    lm_ids = np.where(mask, 0, ids)
    au_ids = np.where(mask, ids - offset, 0)
    lm_e = np.asarray(params["lm_embed"])[lm_ids]
    au_e = np.asarray(params["audio_embed"])[au_ids]
    merged = np.where(mask[:, None], au_e, lm_e)
    logits = merged.astype(np.float64) @ np.asarray(params["audio_head_w"], np.float64)
    logits = logits + np.asarray(params["audio_head_b"], np.float64)
    c_logits = logits[mask]                                   # [N, V2]
    c_labels = lab[mask] - offset
    c_labels = np.where(c_labels < 0, -100, c_labels)
    shifted = np.concatenate([c_labels[1:], [-100]])          # pad + shift
    valid = shifted != -100
    m = c_logits.max(axis=-1, keepdims=True)
    lse = (m + np.log(np.exp(c_logits - m).sum(-1, keepdims=True)))[:, 0]
    picked = c_logits[np.arange(c_logits.shape[0]), np.where(valid, shifted, 0)]
    per = np.where(valid, lse - picked, 0.0)
    return per.sum() / max(valid.sum(), 1)


if __name__ == "__main__":
    B, S, H = 2, 16, 32
    VOCAB = 126                 # audio codebook size -> V2 = 128
    V2 = VOCAB + 2
    LM_VOCAB = 1000
    OFFSET = 1000               # audio_code_offset

    key = jax.random.PRNGKey(0)
    k1, k2, k3, k4, k5, k6 = jax.random.split(key, 6)

    text_ids = jax.random.randint(k1, (B, S), 1, LM_VOCAB)
    audio_codes = jax.random.randint(k2, (B, S), 0, VOCAB)
    pos = jnp.arange(B * S).reshape(B, S)
    is_audio = (pos % 3) == 0
    input_ids = jnp.where(is_audio, audio_codes + OFFSET, text_ids).astype(jnp.int32)

    labels = jnp.array(input_ids)
    # exercise the "labels[labels < 0] = -100" branch: a text-range label at an
    # audio position becomes ignored after the offset subtraction.
    labels = labels.at[0, 0].set(5)

    params = {
        "lm_embed": 0.02 * jax.random.normal(k3, (LM_VOCAB, H), jnp.float32),
        "audio_embed": 0.02 * jax.random.normal(k4, (V2, H), jnp.float32),
        "audio_head_w": 0.02 * jax.random.normal(k5, (H, V2), jnp.float32),
        "audio_head_b": 0.02 * jax.random.normal(k6, (V2,), jnp.float32),
    }

    prepared = prepare_params(params)          # one-time bf16 cast (hoisted)
    loss = separate_head_forward(input_ids, labels, prepared, OFFSET)
    loss = jax.block_until_ready(loss)

    ref = reference_loss(input_ids, labels, params, OFFSET)
    assert np.isfinite(float(loss)), "loss is not finite"
    assert abs(float(loss) - float(ref)) < 2e-2 * max(1.0, abs(float(ref))), \
        f"mismatch: pallas={float(loss)} ref={float(ref)}"

    print("KERNEL_OK")
</pallas_src>

<mosaic_0001>
module attributes {stable_mosaic.version = 11 : i64} {
  func.func @fused_head_ce_kernel(%arg0: i32, %arg1: i32, %arg2: i32, %arg3: memref<32x32xbf16, #tpu.memory_space<vmem>>, %arg4: memref<32x1xi32, #tpu.memory_space<vmem>>, %arg5: memref<32x128xbf16, #tpu.memory_space<vmem>>, %arg6: memref<1x128xf32, #tpu.memory_space<vmem>>, %arg7: memref<1x8x128xf32, #tpu.memory_space<vmem>>, %arg8: memref<1x8x128xf32, #tpu.memory_space<vmem>>, %arg9: memref<32x128xf32, #tpu.memory_space<vmem>>, %arg10: memref<1x1xf32, #tpu.memory_space<vmem>>, %arg11: memref<1x1xf32, #tpu.memory_space<vmem>>) attributes {dimension_semantics = [#tpu.dimension_semantics<parallel>, #tpu.dimension_semantics<arbitrary>, #tpu.dimension_semantics<arbitrary>], iteration_bounds = array<i64: 1, 1, 1>, scalar_prefetch = 0 : i64, scratch_operands = 3 : i64, tpu.core_type = #tpu.core_type<tc>, window_params = [{transform_indices = @transform_0, window_bounds = array<i64: 32, 32>}, {transform_indices = @transform_1, window_bounds = array<i64: 32, 1>}, {pipeline_mode = #tpu.pipeline_mode<synchronous>, transform_indices = @transform_2, window_bounds = array<i64: 32, 128>}, {pipeline_mode = #tpu.pipeline_mode<synchronous>, transform_indices = @transform_3, window_bounds = array<i64: 1, 128>}, {transform_indices = @transform_4, window_bounds = array<i64: 1, 8, 128>}, {transform_indices = @transform_5, window_bounds = array<i64: 1, 8, 128>}]} {
    %c0_i32 = arith.constant 0 : i32
    %0 = arith.cmpi eq, %arg1, %c0_i32 : i32
    %c0_i32_0 = arith.constant 0 : i32
    %1 = arith.cmpi eq, %arg2, %c0_i32_0 : i32
    %2 = arith.andi %0, %1 : i1
    %3 = arith.extui %2 : i1 to i32
    %c0_i32_1 = arith.constant 0 : i32
    %4 = arith.cmpi ne, %3, %c0_i32_1 : i32
    scf.if %4 {
      %cst_16 = arith.constant 0.000000e+00 : f32
      %22 = vector.broadcast %cst_16 : f32 to vector<1x1xf32>
      %c0_17 = arith.constant 0 : index
      %c0_18 = arith.constant 0 : index
      %23 = vector.load %arg10[%c0_17, %c0_18] : memref<1x1xf32, #tpu.memory_space<vmem>>, vector<1x1xf32>
      tpu.vector_store %arg10[%c0_17, %c0_18], %22 {strides = array<i32>} : memref<1x1xf32, #tpu.memory_space<vmem>>, vector<1x1xf32>,
      %cst_19 = arith.constant 0.000000e+00 : f32
      %24 = vector.broadcast %cst_19 : f32 to vector<1x1xf32>
      %c0_20 = arith.constant 0 : index
      %c0_21 = arith.constant 0 : index
      %25 = vector.load %arg11[%c0_20, %c0_21] : memref<1x1xf32, #tpu.memory_space<vmem>>, vector<1x1xf32>
      tpu.vector_store %arg11[%c0_20, %c0_21], %24 {strides = array<i32>} : memref<1x1xf32, #tpu.memory_space<vmem>>, vector<1x1xf32>,
    } else {
    }
    %c0_i32_2 = arith.constant 0 : i32
    %5 = arith.cmpi eq, %arg2, %c0_i32_2 : i32
    %6 = arith.extui %5 : i1 to i32
    %c0_i32_3 = arith.constant 0 : i32
    %7 = arith.cmpi ne, %6, %c0_i32_3 : i32
    scf.if %7 {
      %cst_16 = arith.constant 0.000000e+00 : f32
      %22 = vector.broadcast %cst_16 : f32 to vector<32x128xf32>
      %c0_17 = arith.constant 0 : index
      %c0_18 = arith.constant 0 : index
      %23 = vector.load %arg9[%c0_17, %c0_18] : memref<32x128xf32, #tpu.memory_space<vmem>>, vector<32x128xf32>
      tpu.vector_store %arg9[%c0_17, %c0_18], %22 {strides = array<i32>} : memref<32x128xf32, #tpu.memory_space<vmem>>, vector<32x128xf32>,
    } else {
    }
    %c0 = arith.constant 0 : index
    %c0_4 = arith.constant 0 : index
    %8 = vector.load %arg9[%c0, %c0_4] : memref<32x128xf32, #tpu.memory_space<vmem>>, vector<32x128xf32>
    %c0_5 = arith.constant 0 : index
    %c0_6 = arith.constant 0 : index
    %9 = vector.load %arg3[%c0_5, %c0_6] : memref<32x32xbf16, #tpu.memory_space<vmem>>, vector<32x32xbf16>
    %c0_7 = arith.constant 0 : index
    %c0_8 = arith.constant 0 : index
    %10 = vector.load %arg5[%c0_7, %c0_8] : memref<32x128xbf16, #tpu.memory_space<vmem>>, vector<32x128xbf16>
    %cst = arith.constant dense<0.000000e+00> : vector<32x128xf32>
    %11 = tpu.matmul %9, %10, %cst {dimension_numbers = #tpu.dot_dimension_numbers<[1], [0], [0], [1], [0, 0, 1, 1], [], []>} : vector<32x32xbf16>, vector<32x128xbf16>, vector<32x128xf32> -> vector<32x128xf32>
    %12 = arith.addf %8, %11 : vector<32x128xf32>
    %c0_9 = arith.constant 0 : index
    %c0_10 = arith.constant 0 : index
    %13 = vector.load %arg9[%c0_9, %c0_10] : memref<32x128xf32, #tpu.memory_space<vmem>>, vector<32x128xf32>
    tpu.vector_store %arg9[%c0_9, %c0_10], %12 {strides = array<i32>} : memref<32x128xf32, #tpu.memory_space<vmem>>, vector<32x128xf32>,
    %c0_i32_11 = arith.constant 0 : i32
    %14 = arith.cmpi eq, %arg2, %c0_i32_11 : i32
    %15 = arith.extui %14 : i1 to i32
    %c0_i32_12 = arith.constant 0 : i32
    %16 = arith.cmpi ne, %15, %c0_i32_12 : i32
    scf.if %16 {
      %c0_16 = arith.constant 0 : index
      %c0_17 = arith.constant 0 : index
      %22 = vector.load %arg9[%c0_16, %c0_17] : memref<32x128xf32, #tpu.memory_space<vmem>>, vector<32x128xf32>
      %c0_18 = arith.constant 0 : index
      %c0_19 = arith.constant 0 : index
      %23 = vector.load %arg6[%c0_18, %c0_19] : memref<1x128xf32, #tpu.memory_space<vmem>>, vector<1x128xf32>
      %24 = vector.broadcast %23 : vector<1x128xf32> to vector<32x128xf32>
      %25 = arith.addf %22, %24 : vector<32x128xf32>
      %c0_20 = arith.constant 0 : index
      %c0_21 = arith.constant 0 : index
      %26 = vector.load %arg4[%c0_20, %c0_21] : memref<32x1xi32, #tpu.memory_space<vmem>>, vector<32x1xi32>
      %cst_22 = arith.constant dense<0xFF800000> : vector<32xf32>
      %27 = vector.multi_reduction <maximumf>, %25, %cst_22 [1] : vector<32x128xf32> to vector<32xf32>
      %28 = vector.shape_cast %27 : vector<32xf32> to vector<32x1xf32>
      %29 = vector.broadcast %28 : vector<32x1xf32> to vector<32x128xf32>
      %30 = arith.subf %25, %29 : vector<32x128xf32>
      %31 = math.exp %30 : vector<32x128xf32>
      %cst_23 = arith.constant dense<0.000000e+00> : vector<32xf32>
      %32 = vector.multi_reduction <add>, %31, %cst_23 [1] : vector<32x128xf32> to vector<32xf32>
      %33 = vector.shape_cast %32 : vector<32xf32> to vector<32x1xf32>
      %34 = tpu.iota {dimensions = array<i32: 1>} : vector<32x128xi32>
      %35 = vector.broadcast %26 : vector<32x1xi32> to vector<32x128xi32>
      %36 = arith.cmpi eq, %34, %35 : vector<32x128xi32>
      %cst_24 = arith.constant 0.000000e+00 : f32
      %37 = vector.broadcast %cst_24 : f32 to vector<32x128xf32>
      %38 = arith.select %36, %25, %37 : vector<32x128xi1>, vector<32x128xf32>
      %cst_25 = arith.constant dense<0.000000e+00> : vector<32xf32>
      %39 = vector.multi_reduction <add>, %38, %cst_25 [1] : vector<32x128xf32> to vector<32xf32>
      %40 = vector.shape_cast %39 : vector<32xf32> to vector<32x1xf32>
      %c0_i32_26 = arith.constant 0 : i32
      %41 = vector.broadcast %c0_i32_26 : i32 to vector<32x1xi32>
      %42 = arith.cmpi sge, %26, %41 : vector<32x1xi32>
      %c128_i32 = arith.constant 128 : i32
      %43 = vector.broadcast %c128_i32 : i32 to vector<32x1xi32>
      %44 = arith.cmpi slt, %26, %43 : vector<32x1xi32>
      %45 = arith.andi %42, %44 : vector<32x1xi1>
      %46 = math.log %33 : vector<32x1xf32>
      %47 = arith.addf %28, %46 : vector<32x1xf32>
      %48 = arith.subf %47, %40 : vector<32x1xf32>
      %cst_27 = arith.constant 0.000000e+00 : f32
      %49 = vector.broadcast %cst_27 : f32 to vector<32x1xf32>
      %50 = arith.select %45, %48, %49 : vector<32x1xi1>, vector<32x1xf32>
      %c0_28 = arith.constant 0 : index
      %c0_29 = arith.constant 0 : index
      %51 = vector.load %arg10[%c0_28, %c0_29] : memref<1x1xf32, #tpu.memory_space<vmem>>, vector<1x1xf32>
      %cst_30 = arith.constant dense<0.000000e+00> : vector<1xf32>
      %52 = vector.multi_reduction <add>, %50, %cst_30 [0] : vector<32x1xf32> to vector<1xf32>
      %53 = vector.shape_cast %52 : vector<1xf32> to vector<1x1xf32>
      %54 = arith.addf %51, %53 : vector<1x1xf32>
      %c0_31 = arith.constant 0 : index
      %c0_32 = arith.constant 0 : index
      %55 = vector.load %arg10[%c0_31, %c0_32] : memref<1x1xf32, #tpu.memory_space<vmem>>, vector<1x1xf32>
      tpu.vector_store %arg10[%c0_31, %c0_32], %54 {strides = array<i32>} : memref<1x1xf32, #tpu.memory_space<vmem>>, vector<1x1xf32>,
      %c0_33 = arith.constant 0 : index
      %c0_34 = arith.constant 0 : index
      %56 = vector.load %arg11[%c0_33, %c0_34] : memref<1x1xf32, #tpu.memory_space<vmem>>, vector<1x1xf32>
      %57 = arith.extui %45 : vector<32x1xi1> to vector<32x1xi32>
      %58 = arith.sitofp %57 : vector<32x1xi32> to vector<32x1xf32>
      %cst_35 = arith.constant dense<0.000000e+00> : vector<1xf32>
      %59 = vector.multi_reduction <add>, %58, %cst_35 [0] : vector<32x1xf32> to vector<1xf32>
      %60 = vector.shape_cast %59 : vector<1xf32> to vector<1x1xf32>
      %61 = arith.addf %56, %60 : vector<1x1xf32>
      %c0_36 = arith.constant 0 : index
      %c0_37 = arith.constant 0 : index
      %62 = vector.load %arg11[%c0_36, %c0_37] : memref<1x1xf32, #tpu.memory_space<vmem>>, vector<1x1xf32>
      tpu.vector_store %arg11[%c0_36, %c0_37], %61 {strides = array<i32>} : memref<1x1xf32, #tpu.memory_space<vmem>>, vector<1x1xf32>,
    } else {
    }
    %c0_i32_13 = arith.constant 0 : i32
    %17 = arith.cmpi eq, %arg1, %c0_i32_13 : i32
    %c0_i32_14 = arith.constant 0 : i32
    %18 = arith.cmpi eq, %arg2, %c0_i32_14 : i32
    %19 = arith.andi %17, %18 : i1
    %20 = arith.extui %19 : i1 to i32
    %c0_i32_15 = arith.constant 0 : i32
    %21 = arith.cmpi ne, %20, %c0_i32_15 : i32
    scf.if %21 {
      %cst_16 = arith.constant 0.000000e+00 : f32
      %22 = vector.broadcast %cst_16 : f32 to vector<1x8x128xf32>
      %c0_17 = arith.constant 0 : index
      %c0_18 = arith.constant 0 : index
      %23 = vector.load %arg10[%c0_17, %c0_18] : memref<1x1xf32, #tpu.memory_space<vmem>>, vector<1x1xf32>
      %24 = vector.shape_cast %23 : vector<1x1xf32> to vector<1x1x1xf32>
      %25 = vector.broadcast %24 : vector<1x1x1xf32> to vector<1x8x128xf32>
      %26 = arith.addf %22, %25 : vector<1x8x128xf32>
      %c0_19 = arith.constant 0 : index
      %c0_20 = arith.constant 0 : index
      %c0_21 = arith.constant 0 : index
      %27 = vector.load %arg7[%c0_19, %c0_20, %c0_21] : memref<1x8x128xf32, #tpu.memory_space<vmem>>, vector<1x8x128xf32>
      tpu.vector_store %arg7[%c0_19, %c0_20, %c0_21], %26 {strides = array<i32>} : memref<1x8x128xf32, #tpu.memory_space<vmem>>, vector<1x8x128xf32>,
      %cst_22 = arith.constant 0.000000e+00 : f32
      %28 = vector.broadcast %cst_22 : f32 to vector<1x8x128xf32>
      %c0_23 = arith.constant 0 : index
      %c0_24 = arith.constant 0 : index
      %29 = vector.load %arg11[%c0_23, %c0_24] : memref<1x1xf32, #tpu.memory_space<vmem>>, vector<1x1xf32>
      %30 = vector.shape_cast %29 : vector<1x1xf32> to vector<1x1x1xf32>
      %31 = vector.broadcast %30 : vector<1x1x1xf32> to vector<1x8x128xf32>
      %32 = arith.addf %28, %31 : vector<1x8x128xf32>
      %c0_25 = arith.constant 0 : index
      %c0_26 = arith.constant 0 : index
      %c0_27 = arith.constant 0 : index
      %33 = vector.load %arg8[%c0_25, %c0_26, %c0_27] : memref<1x8x128xf32, #tpu.memory_space<vmem>>, vector<1x8x128xf32>
      tpu.vector_store %arg8[%c0_25, %c0_26, %c0_27], %32 {strides = array<i32>} : memref<1x8x128xf32, #tpu.memory_space<vmem>>, vector<1x8x128xf32>,
    } else {
    }
    return
  }
  func.func @transform_0(%arg0: i32, %arg1: i32, %arg2: i32) -> (i32, i32) {
    %c1_i32 = arith.constant 1 : i32
    %0 = arith.muli %arg0, %c1_i32 : i32
    %1 = arith.addi %0, %arg1 : i32
    %c0_i32 = arith.constant 0 : i32
    return %1, %arg2 : i32, i32
  }
  func.func @transform_1(%arg0: i32, %arg1: i32, %arg2: i32) -> (i32, i32) {
    %c1_i32 = arith.constant 1 : i32
    %0 = arith.muli %arg0, %c1_i32 : i32
    %1 = arith.addi %0, %arg1 : i32
    %c0_i32 = arith.constant 0 : i32
    %c0_i32_0 = arith.constant 0 : i32
    return %1, %c0_i32 : i32, i32
  }
  func.func @transform_2(%arg0: i32, %arg1: i32, %arg2: i32) -> (i32, i32) {
    %c0_i32 = arith.constant 0 : i32
    %c0_i32_0 = arith.constant 0 : i32
    return %arg2, %c0_i32 : i32, i32
  }
  func.func @transform_3(%arg0: i32, %arg1: i32, %arg2: i32) -> (i32, i32) {
    %c0_i32 = arith.constant 0 : i32
    %c0_i32_0 = arith.constant 0 : i32
    %c0_i32_1 = arith.constant 0 : i32
    return %c0_i32, %c0_i32_0 : i32, i32
  }
  func.func @transform_4(%arg0: i32, %arg1: i32, %arg2: i32) -> (i32, i32, i32) {
    %c0_i32 = arith.constant 0 : i32
    %c0_i32_0 = arith.constant 0 : i32
    %c0_i32_1 = arith.constant 0 : i32
    return %arg0, %c0_i32, %c0_i32_0 : i32, i32, i32
  }
  func.func @transform_5(%arg0: i32, %arg1: i32, %arg2: i32) -> (i32, i32, i32) {
    %c0_i32 = arith.constant 0 : i32
    %c0_i32_0 = arith.constant 0 : i32
    %c0_i32_1 = arith.constant 0 : i32
    return %arg0, %c0_i32, %c0_i32_0 : i32, i32, i32
  }
}

module attributes {stable_mosaic.version = 11 : i64} {
  func.func @fused_head_ce_kernel(%arg0: i32, %arg1: i32, %arg2: i32, %arg3: memref<32x32xbf16, #tpu.memory_space<vmem>>, %arg4: memref<32x1xi32, #tpu.memory_space<vmem>>, %arg5: memref<32x128xbf16, #tpu.memory_space<vmem>>, %arg6: memref<1x128xf32, #tpu.memory_space<vmem>>, %arg7: memref<1x8x128xf32, #tpu.memory_space<vmem>>, %arg8: memref<1x8x128xf32, #tpu.memory_space<vmem>>, %arg9: memref<32x128xf32, #tpu.memory_space<vmem>>, %arg10: memref<1x1xf32, #tpu.memory_space<vmem>>, %arg11: memref<1x1xf32, #tpu.memory_space<vmem>>) attributes {dimension_semantics = [#tpu.dimension_semantics<parallel>, #tpu.dimension_semantics<arbitrary>, #tpu.dimension_semantics<arbitrary>], iteration_bounds = array<i64: 1, 1, 1>, scalar_prefetch = 0 : i64, scratch_operands = 3 : i64, tpu.core_type = #tpu.core_type<tc>, window_params = [{transform_indices = @transform_0, window_bounds = array<i64: 32, 32>}, {transform_indices = @transform_1, window_bounds = array<i64: 32, 1>}, {transform_indices = @transform_2, window_bounds = array<i64: 32, 128>}, {pipeline_mode = #tpu.pipeline_mode<synchronous>, transform_indices = @transform_3, window_bounds = array<i64: 1, 128>}, {transform_indices = @transform_4, window_bounds = array<i64: 1, 8, 128>}, {transform_indices = @transform_5, window_bounds = array<i64: 1, 8, 128>}]} {
    %c0_i32 = arith.constant 0 : i32
    %0 = arith.cmpi eq, %arg1, %c0_i32 : i32
    %c0_i32_0 = arith.constant 0 : i32
    %1 = arith.cmpi eq, %arg2, %c0_i32_0 : i32
    %2 = arith.andi %0, %1 : i1
    %3 = arith.extui %2 : i1 to i32
    %c0_i32_1 = arith.constant 0 : i32
    %4 = arith.cmpi ne, %3, %c0_i32_1 : i32
    scf.if %4 {
      %cst_16 = arith.constant 0.000000e+00 : f32
      %22 = vector.broadcast %cst_16 : f32 to vector<1x1xf32>
      %c0_17 = arith.constant 0 : index
      %c0_18 = arith.constant 0 : index
      %23 = vector.load %arg10[%c0_17, %c0_18] : memref<1x1xf32, #tpu.memory_space<vmem>>, vector<1x1xf32>
      tpu.vector_store %arg10[%c0_17, %c0_18], %22 {strides = array<i32>} : memref<1x1xf32, #tpu.memory_space<vmem>>, vector<1x1xf32>,
      %cst_19 = arith.constant 0.000000e+00 : f32
      %24 = vector.broadcast %cst_19 : f32 to vector<1x1xf32>
      %c0_20 = arith.constant 0 : index
      %c0_21 = arith.constant 0 : index
      %25 = vector.load %arg11[%c0_20, %c0_21] : memref<1x1xf32, #tpu.memory_space<vmem>>, vector<1x1xf32>
      tpu.vector_store %arg11[%c0_20, %c0_21], %24 {strides = array<i32>} : memref<1x1xf32, #tpu.memory_space<vmem>>, vector<1x1xf32>,
    } else {
    }
    %c0_i32_2 = arith.constant 0 : i32
    %5 = arith.cmpi eq, %arg2, %c0_i32_2 : i32
    %6 = arith.extui %5 : i1 to i32
    %c0_i32_3 = arith.constant 0 : i32
    %7 = arith.cmpi ne, %6, %c0_i32_3 : i32
    scf.if %7 {
      %cst_16 = arith.constant 0.000000e+00 : f32
      %22 = vector.broadcast %cst_16 : f32 to vector<32x128xf32>
      %c0_17 = arith.constant 0 : index
      %c0_18 = arith.constant 0 : index
      %23 = vector.load %arg9[%c0_17, %c0_18] : memref<32x128xf32, #tpu.memory_space<vmem>>, vector<32x128xf32>
      tpu.vector_store %arg9[%c0_17, %c0_18], %22 {strides = array<i32>} : memref<32x128xf32, #tpu.memory_space<vmem>>, vector<32x128xf32>,
    } else {
    }
    %c0 = arith.constant 0 : index
    %c0_4 = arith.constant 0 : index
    %8 = vector.load %arg9[%c0, %c0_4] : memref<32x128xf32, #tpu.memory_space<vmem>>, vector<32x128xf32>
    %c0_5 = arith.constant 0 : index
    %c0_6 = arith.constant 0 : index
    %9 = vector.load %arg3[%c0_5, %c0_6] : memref<32x32xbf16, #tpu.memory_space<vmem>>, vector<32x32xbf16>
    %c0_7 = arith.constant 0 : index
    %c0_8 = arith.constant 0 : index
    %10 = vector.load %arg5[%c0_7, %c0_8] : memref<32x128xbf16, #tpu.memory_space<vmem>>, vector<32x128xbf16>
    %cst = arith.constant dense<0.000000e+00> : vector<32x128xf32>
    %11 = tpu.matmul %9, %10, %cst {dimension_numbers = #tpu.dot_dimension_numbers<[1], [0], [0], [1], [0, 0, 1, 1], [], []>} : vector<32x32xbf16>, vector<32x128xbf16>, vector<32x128xf32> -> vector<32x128xf32>
    %12 = arith.addf %8, %11 : vector<32x128xf32>
    %c0_9 = arith.constant 0 : index
    %c0_10 = arith.constant 0 : index
    %13 = vector.load %arg9[%c0_9, %c0_10] : memref<32x128xf32, #tpu.memory_space<vmem>>, vector<32x128xf32>
    tpu.vector_store %arg9[%c0_9, %c0_10], %12 {strides = array<i32>} : memref<32x128xf32, #tpu.memory_space<vmem>>, vector<32x128xf32>,
    %c0_i32_11 = arith.constant 0 : i32
    %14 = arith.cmpi eq, %arg2, %c0_i32_11 : i32
    %15 = arith.extui %14 : i1 to i32
    %c0_i32_12 = arith.constant 0 : i32
    %16 = arith.cmpi ne, %15, %c0_i32_12 : i32
    scf.if %16 {
      %c0_16 = arith.constant 0 : index
      %c0_17 = arith.constant 0 : index
      %22 = vector.load %arg9[%c0_16, %c0_17] : memref<32x128xf32, #tpu.memory_space<vmem>>, vector<32x128xf32>
      %c0_18 = arith.constant 0 : index
      %c0_19 = arith.constant 0 : index
      %23 = vector.load %arg6[%c0_18, %c0_19] : memref<1x128xf32, #tpu.memory_space<vmem>>, vector<1x128xf32>
      %24 = vector.broadcast %23 : vector<1x128xf32> to vector<32x128xf32>
      %25 = arith.addf %22, %24 : vector<32x128xf32>
      %c0_20 = arith.constant 0 : index
      %c0_21 = arith.constant 0 : index
      %26 = vector.load %arg4[%c0_20, %c0_21] : memref<32x1xi32, #tpu.memory_space<vmem>>, vector<32x1xi32>
      %cst_22 = arith.constant dense<0xFF800000> : vector<32xf32>
      %27 = vector.multi_reduction <maximumf>, %25, %cst_22 [1] : vector<32x128xf32> to vector<32xf32>
      %28 = vector.shape_cast %27 : vector<32xf32> to vector<32x1xf32>
      %29 = vector.broadcast %28 : vector<32x1xf32> to vector<32x128xf32>
      %30 = arith.subf %25, %29 : vector<32x128xf32>
      %31 = math.exp %30 : vector<32x128xf32>
      %cst_23 = arith.constant dense<0.000000e+00> : vector<32xf32>
      %32 = vector.multi_reduction <add>, %31, %cst_23 [1] : vector<32x128xf32> to vector<32xf32>
      %33 = vector.shape_cast %32 : vector<32xf32> to vector<32x1xf32>
      %34 = tpu.iota {dimensions = array<i32: 1>} : vector<32x128xi32>
      %35 = vector.broadcast %26 : vector<32x1xi32> to vector<32x128xi32>
      %36 = arith.cmpi eq, %34, %35 : vector<32x128xi32>
      %cst_24 = arith.constant 0.000000e+00 : f32
      %37 = vector.broadcast %cst_24 : f32 to vector<32x128xf32>
      %38 = arith.select %36, %25, %37 : vector<32x128xi1>, vector<32x128xf32>
      %cst_25 = arith.constant dense<0.000000e+00> : vector<32xf32>
      %39 = vector.multi_reduction <add>, %38, %cst_25 [1] : vector<32x128xf32> to vector<32xf32>
      %40 = vector.shape_cast %39 : vector<32xf32> to vector<32x1xf32>
      %c0_i32_26 = arith.constant 0 : i32
      %41 = vector.broadcast %c0_i32_26 : i32 to vector<32x1xi32>
      %42 = arith.cmpi sge, %26, %41 : vector<32x1xi32>
      %c128_i32 = arith.constant 128 : i32
      %43 = vector.broadcast %c128_i32 : i32 to vector<32x1xi32>
      %44 = arith.cmpi slt, %26, %43 : vector<32x1xi32>
      %45 = arith.andi %42, %44 : vector<32x1xi1>
      %46 = math.log %33 : vector<32x1xf32>
      %47 = arith.addf %28, %46 : vector<32x1xf32>
      %48 = arith.subf %47, %40 : vector<32x1xf32>
      %cst_27 = arith.constant 0.000000e+00 : f32
      %49 = vector.broadcast %cst_27 : f32 to vector<32x1xf32>
      %50 = arith.select %45, %48, %49 : vector<32x1xi1>, vector<32x1xf32>
      %c0_28 = arith.constant 0 : index
      %c0_29 = arith.constant 0 : index
      %51 = vector.load %arg10[%c0_28, %c0_29] : memref<1x1xf32, #tpu.memory_space<vmem>>, vector<1x1xf32>
      %cst_30 = arith.constant dense<0.000000e+00> : vector<1xf32>
      %52 = vector.multi_reduction <add>, %50, %cst_30 [0] : vector<32x1xf32> to vector<1xf32>
      %53 = vector.shape_cast %52 : vector<1xf32> to vector<1x1xf32>
      %54 = arith.addf %51, %53 : vector<1x1xf32>
      %c0_31 = arith.constant 0 : index
      %c0_32 = arith.constant 0 : index
      %55 = vector.load %arg10[%c0_31, %c0_32] : memref<1x1xf32, #tpu.memory_space<vmem>>, vector<1x1xf32>
      tpu.vector_store %arg10[%c0_31, %c0_32], %54 {strides = array<i32>} : memref<1x1xf32, #tpu.memory_space<vmem>>, vector<1x1xf32>,
      %c0_33 = arith.constant 0 : index
      %c0_34 = arith.constant 0 : index
      %56 = vector.load %arg11[%c0_33, %c0_34] : memref<1x1xf32, #tpu.memory_space<vmem>>, vector<1x1xf32>
      %57 = arith.extui %45 : vector<32x1xi1> to vector<32x1xi32>
      %58 = arith.sitofp %57 : vector<32x1xi32> to vector<32x1xf32>
      %cst_35 = arith.constant dense<0.000000e+00> : vector<1xf32>
      %59 = vector.multi_reduction <add>, %58, %cst_35 [0] : vector<32x1xf32> to vector<1xf32>
      %60 = vector.shape_cast %59 : vector<1xf32> to vector<1x1xf32>
      %61 = arith.addf %56, %60 : vector<1x1xf32>
      %c0_36 = arith.constant 0 : index
      %c0_37 = arith.constant 0 : index
      %62 = vector.load %arg11[%c0_36, %c0_37] : memref<1x1xf32, #tpu.memory_space<vmem>>, vector<1x1xf32>
      tpu.vector_store %arg11[%c0_36, %c0_37], %61 {strides = array<i32>} : memref<1x1xf32, #tpu.memory_space<vmem>>, vector<1x1xf32>,
    } else {
    }
    %c0_i32_13 = arith.constant 0 : i32
    %17 = arith.cmpi eq, %arg1, %c0_i32_13 : i32
    %c0_i32_14 = arith.constant 0 : i32
    %18 = arith.cmpi eq, %arg2, %c0_i32_14 : i32
    %19 = arith.andi %17, %18 : i1
    %20 = arith.extui %19 : i1 to i32
    %c0_i32_15 = arith.constant 0 : i32
    %21 = arith.cmpi ne, %20, %c0_i32_15 : i32
    scf.if %21 {
      %cst_16 = arith.constant 0.000000e+00 : f32
      %22 = vector.broadcast %cst_16 : f32 to vector<1x8x128xf32>
      %c0_17 = arith.constant 0 : index
      %c0_18 = arith.constant 0 : index
      %23 = vector.load %arg10[%c0_17, %c0_18] : memref<1x1xf32, #tpu.memory_space<vmem>>, vector<1x1xf32>
      %24 = vector.shape_cast %23 : vector<1x1xf32> to vector<1x1x1xf32>
      %25 = vector.broadcast %24 : vector<1x1x1xf32> to vector<1x8x128xf32>
      %26 = arith.addf %22, %25 : vector<1x8x128xf32>
      %c0_19 = arith.constant 0 : index
      %c0_20 = arith.constant 0 : index
      %c0_21 = arith.constant 0 : index
      %27 = vector.load %arg7[%c0_19, %c0_20, %c0_21] : memref<1x8x128xf32, #tpu.memory_space<vmem>>, vector<1x8x128xf32>
      tpu.vector_store %arg7[%c0_19, %c0_20, %c0_21], %26 {strides = array<i32>} : memref<1x8x128xf32, #tpu.memory_space<vmem>>, vector<1x8x128xf32>,
      %cst_22 = arith.constant 0.000000e+00 : f32
      %28 = vector.broadcast %cst_22 : f32 to vector<1x8x128xf32>
      %c0_23 = arith.constant 0 : index
      %c0_24 = arith.constant 0 : index
      %29 = vector.load %arg11[%c0_23, %c0_24] : memref<1x1xf32, #tpu.memory_space<vmem>>, vector<1x1xf32>
      %30 = vector.shape_cast %29 : vector<1x1xf32> to vector<1x1x1xf32>
      %31 = vector.broadcast %30 : vector<1x1x1xf32> to vector<1x8x128xf32>
      %32 = arith.addf %28, %31 : vector<1x8x128xf32>
      %c0_25 = arith.constant 0 : index
      %c0_26 = arith.constant 0 : index
      %c0_27 = arith.constant 0 : index
      %33 = vector.load %arg8[%c0_25, %c0_26, %c0_27] : memref<1x8x128xf32, #tpu.memory_space<vmem>>, vector<1x8x128xf32>
      tpu.vector_store %arg8[%c0_25, %c0_26, %c0_27], %32 {strides = array<i32>} : memref<1x8x128xf32, #tpu.memory_space<vmem>>, vector<1x8x128xf32>,
    } else {
    }
    return
  }
  func.func @transform_0(%arg0: i32, %arg1: i32, %arg2: i32) -> (i32, i32) {
    %c1_i32 = arith.constant 1 : i32
    %0 = arith.muli %arg0, %c1_i32 : i32
    %1 = arith.addi %0, %arg1 : i32
    %c0_i32 = arith.constant 0 : i32
    return %1, %arg2 : i32, i32
  }
  func.func @transform_1(%arg0: i32, %arg1: i32, %arg2: i32) -> (i32, i32) {
    %c1_i32 = arith.constant 1 : i32
    %0 = arith.muli %arg0, %c1_i32 : i32
    %1 = arith.addi %0, %arg1 : i32
    %c0_i32 = arith.constant 0 : i32
    %c0_i32_0 = arith.constant 0 : i32
    return %1, %c0_i32 : i32, i32
  }
  func.func @transform_2(%arg0: i32, %arg1: i32, %arg2: i32) -> (i32, i32) {
    %c0_i32 = arith.constant 0 : i32
    %c0_i32_0 = arith.constant 0 : i32
    return %arg2, %c0_i32 : i32, i32
  }
  func.func @transform_3(%arg0: i32, %arg1: i32, %arg2: i32) -> (i32, i32) {
    %c0_i32 = arith.constant 0 : i32
    %c0_i32_0 = arith.constant 0 : i32
    %c0_i32_1 = arith.constant 0 : i32
    return %c0_i32, %c0_i32_0 : i32, i32
  }
  func.func @transform_4(%arg0: i32, %arg1: i32, %arg2: i32) -> (i32, i32, i32) {
    %c0_i32 = arith.constant 0 : i32
    %c0_i32_0 = arith.constant 0 : i32
    %c0_i32_1 = arith.constant 0 : i32
    return %arg0, %c0_i32, %c0_i32_0 : i32, i32, i32
  }
  func.func @transform_5(%arg0: i32, %arg1: i32, %arg2: i32) -> (i32, i32, i32) {
    %c0_i32 = arith.constant 0 : i32
    %c0_i32_0 = arith.constant 0 : i32
    %c0_i32_1 = arith.constant 0 : i32
    return %arg0, %c0_i32, %c0_i32_0 : i32, i32, i32
  }
}

</mosaic_0001>

<bundles_post_ra>
// kernel: tpu_custom_call.1
= control target key start
LH: loop header
LB: loop body
LE: loop exit
PB: predicated region body
PF: predicated region fallthrough
CT: control target
= control target key end

     0   :  { %11 = vsyncpa [#allocation6], 0  ;;  %vm116_vm0 = vcmask 261120   ;;  %s614_s0 = inlined_call_operand.vmem [shape: bf16[32,32], index: 0, kind: input, shape index: {}]   ;;  %s615_s1 = inlined_call_operand.vmem [shape: s32[32,1], index: 1, kind: input, shape index: {}]   ;;  %s616_s2 = inlined_call_operand.vmem [shape: bf16[32,128], index: 2, kind: input, shape index: {}]   ;;  %s617_s3 = inlined_call_operand.vmem [shape: f32[1,128], index: 3, kind: input, shape index: {}]   ;;  %s618_s4 = inlined_call_operand.hbm [shape: f32[1,8,128], index: 4, kind: output, shape index: {0}]   ;;  %s619_s5 = inlined_call_operand.hbm [shape: f32[1,8,128], index: 5, kind: output, shape index: {1}]  }
   0x1   :  { %v431_v0 = vld [vmem:[%s616_s2 + $0x8] sm:$0xff]   ;;  %v432_v1 = vld [vmem:[%s616_s2] sm:$0xff]  }
   0x2   :  { %417 = vmatprep.subr.bf16.mxu0 %v431_v0  ;;  %v433_v2 = vld [vmem:[%s614_s0] sm:$0xff]  }
   0x3   :  { %418 = vmatpush3.bf16.msra.mxu0 %v431_v0  ;;  %421 = vmatprep.mubr.msk.bf16.mxu0 %vm116_vm0, %v433_v2 }
   0x4   :  { %419 = vmatprep.subr.bf16.mxu0 %v432_v1 }
   0x5   :  { %12 = vsyncpa [#allocation8], 0  ;;  %v434_v3 = vld [vmem:[%s614_s0 + $0x8] sm:$0xff]   ;;  %v495_v4 = vmov 0   ;;  %vm72_vm4 = vcmask 0   ;;  %v200_v7 = vld [vmem:[%s615_s1 + $0x10] sm:$0xff]  ;;  %v230_v55 = vlaneseq }
   0x6   :  { %430 = vset.pattern.permute.xlu1 %v495_v4  ;;  %429 = vset.pattern.permute.xlu0 %v495_v4  ;;  %v199_v5 = vld [vmem:[%s615_s1 + $0x8] sm:$0xff]  ;;  %v496_v8 = vmov 0.0   ;;  %vm262_vm5 = vcmp.ge.s32.totalorder %v200_v7, 0  ;;  %vm266_vm6 = vcmp.lt.s32.totalorder %v200_v7, 128  ;;  %vm293_vm8 = vcmask 7168   ;;  %v198_v11 = vld [vmem:[%s615_s1] sm:$0xff] }
   0x7   :  { %420 = vmatpush3.bf16.msra.mxu0 %v432_v1  ;;  %vm261_vm1 = vcmp.ge.s32.totalorder %v199_v5, 0  ;;  %vm265_vm2 = vcmp.lt.s32.totalorder %v199_v5, 128  ;;  %74 = vst.msk [vmem:[#allocation4] sm:$0x1] %vm72_vm4, %v496_v8  ;;  %73 = vst.msk [vmem:[#allocation3] sm:$0x1] %vm72_vm4, %v496_v8 }
   0x8   :  { %vm544_vm3 = vmand %vm261_vm1, %vm265_vm2  ;;  %vm260_vm9 = vcmp.ge.s32.totalorder %v198_v11, 0  ;;  %vm264_vm10 = vcmp.lt.s32.totalorder %v198_v11, 128  ;;  %v201_v16 = vld [vmem:[%s615_s1 + $0x18] sm:$0xff]  ;;  %v406_v33 = vld [vmem:[%s617_s3] ss:$0 sm:$0xff]  ;;  %v231_v59 = vand.u32 127, %v230_v55 }
   0x9   :  { %vm553_vm7 = vmand %vm262_vm5, %vm266_vm6  ;;  %v408_v10 = vsel %vm544_vm3, 1.0, %v496_v8  ;;  %vm263_vm12 = vcmp.ge.s32.totalorder %v201_v16, 0  ;;  %vm267_vm13 = vcmp.lt.s32.totalorder %v201_v16, 128  ;;  %s497_s3 = smov [#allocation7]  }
   0xa   :  { %422 = vmatmul.mubr.msk.bf16.vlgmr.msra.gmra.mxu0 %vm116_vm0, %v434_v3  ;;  %v409_v12 = vsel %vm553_vm7, 1.0, %v496_v8  ;;  %v320_v13 = vsel %vm293_vm8, %v408_v10, 0.0  ;;  %vm565_vm11 = vmand %vm260_vm9, %vm264_vm10  ;;  %s376_s8 = sshll.u32 %s497_s3, 4  ;;  %s377_s8 = int_to_ptr.vmem [resolvable:$true] %s376_s8 }
   0xb   :  { %v407_v15 = vsel %vm565_vm11, 1.0, %v496_v8  ;;  %v322_v17 = vsel %vm293_vm8, %v409_v12, 0.0  ;;  %vm576_vm14 = vmand %vm263_vm12, %vm267_vm13  ;;  %s451_s9 = scalar_lea.vmem %s377_s8, 128  ;;  %p456_p1 = scmp.lt.s32.totalorder %s377_s8, %s377_s8 }
   0xc   :  { %v319_v18 = vsel %vm293_vm8, %v407_v15, 0.0  ;;  %v410_v21 = vsel %vm576_vm14, 1.0, %v496_v8  ;;  %p452_p0 = scmp.ne.s32.totalorder %s377_s8, %s451_s9  ;;  %p457_p2 = scmp.lt.s32.totalorder %s451_s9, %s451_s9 }
   0xd   :  { %v321_v19 = vadd.f32 %v320_v13, %v319_v18  ;;  %v324_v23 = vsel %vm293_vm8, %v410_v21, 0.0 }
   0xe   :  { %v310_v30 = vld [vmem:[#allocation4] sm:$0x1]  ;;  %p458_p3 = por %p457_p2, %p456_p1 }
   0xf   :  { %v323_v22 = vadd.f32 %v322_v17, %v321_v19 }
  0x10   :  { %p459_p4 = pnand %p458_p3, %p452_p0 }
  0x11   :  { %v325_v24 = vadd.f32 %v324_v23, %v323_v22 }
  0x13   :  { %v326_v25 = vrot.slane %v325_v24, 4 }
  0x15   :  { %v327_v26 = vadd.f32 %v326_v25, %v325_v24 }
  0x17   :  { %v328_v27 = vrot.slane %v327_v26, 2 }
  0x19   :  { %v329_v28 = vadd.f32 %v328_v27, %v327_v26 }
  0x1b   :  { %v330_v29 = vrot.slane %v329_v28, 1 }
  0x1d   :  { %v331_v31 = vadd.f32 %v330_v29, %v329_v28 }
  0x1f   :  { %v332_v32 = vadd.f32 %v331_v31, %v310_v30 }
  0x21   :  { %333 = vst.msk [vmem:[#allocation4] sm:$0x1] %vm72_vm4, %v332_v32 }
  0x28   :  { %v412_v4 = vld [vmem:[#allocation4] ss:$0 sm:$0xff] }
  0xca   :  { %v423_v34 = vpop.f32.mrf.mxu0 }
  0xcb   :  { %v196_v35 = vadd.f32 %v423_v34, %v406_v33 }
  0xcc   :  { %v157_v36 = vpop.f32.mrf.mxu0 }
  0xcd   :  { %v194_v37 = vadd.f32 %v406_v33, %v157_v36  ;;  %206 = vmax.xlane.f32.xlu1 %v196_v35 }
  0xce   :  { %v424_v38 = vpop.f32.mrf.mxu0 }
  0xcf   :  { %v197_v39 = vadd.f32 %v424_v38, %v406_v33  ;;  %202 = vmax.xlane.f32.xlu0 %v194_v37 }
  0xd0   :  { %v160_v40 = vpop.f32.mrf.mxu0 }
  0xd1   :  { %v195_v41 = vadd.f32 %v406_v33, %v160_v40  ;;  %208 = vmax.xlane.f32.xlu1 %v197_v39 }
  0xd3   :  { %204 = vmax.xlane.f32.xlu0 %v195_v41 }
  0xe2   :  { %236 = vperm.xlu1 %430, %v199_v5  }
  0xe6   :  { %239 = vperm.xlu1 %430, %v200_v7  }
  0xe9   :  { %233 = vperm.xlu0 %429, %v198_v11  }
  0xea   :  { %242 = vperm.xlu1 %430, %v201_v16  }
 0x156   :  { %v587_v42 = vpop.xlane.xlu1 %206 }
 0x157   :  { %v212_v43 = vsub.f32 %v196_v35, %v587_v42 }
 0x158   :  { %v203_v44 = vpop.xlane.xlu0 %202 }
 0x159   :  { %v210_v45 = vsub.f32 %v194_v37, %v203_v44  ;;  %v218_v48 = vmul.f32 1.442695, %v212_v43 }
 0x15a   :  { %v590_v46 = vpop.xlane.xlu1 %208 }
 0x15b   :  { %v214_v47 = vmul.f32 1.442695, %v210_v45  ;;  %v213_v50 = vsub.f32 %v197_v39, %v590_v46 }
 0x15c   :  { %v205_v49 = vpop.xlane.xlu0 %204 }
 0x15d   :  { %435 = vpow2.f32 %v214_v47  ;;  %v211_v51 = vsub.f32 %v195_v41, %v205_v49  ;;  %v220_v53 = vmul.f32 1.442695, %v213_v50  ;;  %v292_v47 = vld [vmem:[#allocation3] sm:$0x1] }
 0x15e   :  { %437 = vpow2.f32 %v218_v48  ;;  %v237_v54 = vpop.permute.xlu1 %236 }
 0x15f   :  { %v216_v52 = vmul.f32 1.442695, %v211_v51  ;;  %vm245_vm1 = vcmp.eq.s32.totalorder %v231_v59, %v237_v54 }
 0x160   :  { %v249_v2 = vsel %vm245_vm1, %v195_v41, 0.0 }
 0x161   :  { %439 = vpow2.f32 %v216_v52 }
 0x162   :  { %441 = vpow2.f32 %v220_v53  ;;  %v240_v57 = vpop.permute.xlu1 %239 }
 0x163   :  { %vm246_vm15 = vcmp.eq.s32.totalorder %v231_v59, %v240_v57 }
 0x164   :  { %v234_v61 = vpop.permute.xlu0 %233  ;;  %v250_v63 = vsel %vm246_vm15, %v196_v35, 0.0 }
 0x165   :  { %vm244_vm0 = vcmp.eq.s32.totalorder %v231_v59, %v234_v61 }
 0x166   :  { %v248_v0 = vsel %vm244_vm0, %v194_v37, 0.0  ;;  %v243_v1 = vpop.permute.xlu1 %242 }
 0x167   :  { %vm247_vm2 = vcmp.eq.s32.totalorder %v231_v59, %v243_v1 }
 0x168   :  { %v251_v3 = vsel %vm247_vm2, %v197_v39, 0.0 }
 0x16a   :  { %v436_v56 = vpop.eup %435 }
 0x16b   :  { %222 = vadd.xlane.f32.xlu1 %v436_v56  ;;  %v438_v58 = vpop.eup %437 }
 0x16e   :  { %v440_v60 = vpop.eup %439 }
 0x16f   :  { %226 = vadd.xlane.f32.xlu1 %v438_v58  ;;  %224 = vadd.xlane.f32.xlu0 %v440_v60  ;;  %v442_v62 = vpop.eup %441 }
 0x173   :  { %228 = vadd.xlane.f32.xlu1 %v442_v62  ;;  %256 = vadd.xlane.f32.xlu0 %v250_v63 }
 0x177   :  { %252 = vadd.xlane.f32.xlu1 %v248_v0 }
 0x17b   :  { %254 = vadd.xlane.f32.xlu1 %v249_v2 }
 0x17f   :  { %258 = vadd.xlane.f32.xlu1 %v251_v3 }
 0x190   :  { %355 = vperm.xlu1 %430, %v412_v4  }
 0x1f4   :  { %v223_v5 = vpop.xlane.xlu1 %222 }
 0x1f5   :  { %443 = vlog2.f32 %v223_v5 }
 0x1f8   :  { %v227_v7 = vpop.xlane.xlu1 %226  ;;  %v225_v8 = vpop.xlane.xlu0 %224 }
 0x1f9   :  { %445 = vlog2.f32 %v227_v7 }
 0x1fa   :  { %447 = vlog2.f32 %v225_v8 }
 0x1fc   :  { %v229_v10 = vpop.xlane.xlu1 %228  ;;  %v257_v26 = vpop.xlane.xlu0 %256 }
 0x1fd   :  { %449 = vlog2.f32 %v229_v10 }
 0x200   :  { %v253_v11 = vpop.xlane.xlu1 %252 }
 0x202   :  { %v444_v12 = vpop.eup %443 }
 0x203   :  { %v273_v13 = vmul.f32 0.6931472, %v444_v12 }
 0x204   :  { %v255_v15 = vpop.xlane.xlu1 %254 }
 0x205   :  { %v280_v16 = vadd.f32 %v273_v13, %v203_v44 }
 0x206   :  { %v446_v17 = vpop.eup %445 }
 0x207   :  { %v448_v18 = vpop.eup %447  ;;  %v277_v19 = vmul.f32 0.6931472, %v446_v17  ;;  %v284_v22 = vsub.f32 %v280_v16, %v253_v11 }
 0x208   :  { %v275_v21 = vmul.f32 0.6931472, %v448_v18  ;;  %v259_v23 = vpop.xlane.xlu1 %258 }
 0x209   :  { %v282_v24 = vadd.f32 %v277_v19, %v587_v42  ;;  %v288_v30 = vsel %vm565_vm11, %v284_v22, 0.0 }
 0x20a   :  { %v450_v25 = vpop.eup %449  ;;  %v281_v27 = vadd.f32 %v275_v21, %v205_v49  ;;  %v294_v36 = vsel %vm293_vm8, %v288_v30, 0.0 }
 0x20b   :  { %v279_v28 = vmul.f32 0.6931472, %v450_v25  ;;  %v286_v29 = vsub.f32 %v282_v24, %v257_v26 }
 0x20c   :  { %v285_v31 = vsub.f32 %v281_v27, %v255_v15  ;;  %v356_v32 = vpop.permute.xlu1 %355 }
 0x20d   :  { %v283_v33 = vadd.f32 %v279_v28, %v590_v46  ;;  %359 = vst [vmem:[#allocation7] sm:$0xff] %v356_v32  ;;  %v290_v34 = vsel %vm553_vm7, %v286_v29, 0.0 }
 0x20e   :  { %v289_v35 = vsel %vm544_vm3, %v285_v31, 0.0  ;;  %v297_v14 = vsel %vm293_vm8, %v290_v34, 0.0 }
 0x20f   :  { %v295_v37 = vsel %vm293_vm8, %v289_v35, 0.0  ;;  %v287_v38 = vsub.f32 %v283_v33, %v259_v23 }
 0x210   :  { %v296_v39 = vadd.f32 %v295_v37, %v294_v36 }
 0x211   :  { %v291_v40 = vsel %vm576_vm14, %v287_v38, 0.0 }
 0x212   :  { %v298_v41 = vadd.f32 %v297_v14, %v296_v39  ;;  %v299_v42 = vsel %vm293_vm8, %v291_v40, 0.0 }
 0x214   :  { %v300_v43 = vadd.f32 %v299_v42, %v298_v41 }
 0x216   :  { %v301_v9 = vrot.slane %v300_v43, 4 }
 0x218   :  { %v302_v44 = vadd.f32 %v301_v9, %v300_v43 }
 0x21a   :  { %v303_v45 = vrot.slane %v302_v44, 2 }
 0x21c   :  { %v304_v6 = vadd.f32 %v303_v45, %v302_v44 }
 0x21e   :  { %v305_v46 = vrot.slane %v304_v6, 1 }
 0x220   :  { %v306_v48 = vadd.f32 %v305_v46, %v304_v6 }
 0x222   :  { %v307_v49 = vadd.f32 %v306_v48, %v292_v47 }
 0x224   :  { %309 = vst.msk [vmem:[#allocation3] sm:$0x1] %vm72_vm4, %v307_v49 }
 0x225   :  { %462 = shalt.err (!%p459_p4)
}
 0x226   :  { %379 = dma.vmem_to_hbm [thread:$0]  %s377_s8, 128, %s619_s5, [#allocation8]  }
 0x227   :  { %s498_s12 = smov [#allocation5]  }
 0x228   :  { %s366_s13 = sshll.u32 %s498_s12, 4  ;;  %s367_s13 = int_to_ptr.vmem [resolvable:$true] %s366_s13 }
 0x229   :  { %s471_s14 = scalar_lea.vmem %s367_s13, 128  ;;  %p476_p6 = scmp.lt.s32.totalorder %s367_s13, %s367_s13 }
 0x22a   :  { %p472_p5 = scmp.ne.s32.totalorder %s367_s13, %s471_s14  ;;  %p477_p7 = scmp.lt.s32.totalorder %s471_s14, %s471_s14 }
 0x22b   :  { %v411_v20 = vld [vmem:[#allocation3] ss:$0 sm:$0xff] }
 0x22c   :  { %343 = vperm.xlu0 %429, %v411_v20   ;;  %p478_p8 = por %p477_p7, %p476_p6 }
 0x22e   :  { %p479_p9 = pnand %p478_p8, %p472_p5 }
 0x2a7   :  { %v344_v50 = vpop.permute.xlu0 %343 }
 0x2a8   :  { %347 = vst [vmem:[#allocation5] sm:$0xff] %v344_v50 }
 0x2a9   :  { %482 = shalt.err (!%p479_p9)
}
 0x2aa   :  { %369 = dma.vmem_to_hbm [thread:$0]  %s367_s13, 128, %s618_s4, [#allocation6]  }
 0x2ab   :  { %491 = dma.done.wait [#allocation6], 128  }
 0x2ac   :  { %492 = vsyncadd [#allocation6], 4294967168 }
 0x2ad   :  { %493 = dma.done.wait [#allocation8], 128  }
 0x2ae   :  { %494 = vsyncadd [#allocation8], 4294967168 }
 0x2af   :  { %386 = vsyncpa [#allocation6], 1 }
 0x2b0   :  { %387 = vsyncpa [#allocation8], 1 }

// kernel: tpu_custom_call.1
= control target key start
LH: loop header
LB: loop body
LE: loop exit
PB: predicated region body
PF: predicated region fallthrough
CT: control target
= control target key end

     0   :  { %11 = vsyncpa [#allocation6], 0  ;;  %vm116_vm0 = vcmask 261120   ;;  %s614_s0 = inlined_call_operand.vmem [shape: bf16[32,32], index: 0, kind: input, shape index: {}]   ;;  %s615_s1 = inlined_call_operand.vmem [shape: s32[32,1], index: 1, kind: input, shape index: {}]   ;;  %s616_s2 = inlined_call_operand.vmem [shape: bf16[32,128], index: 2, kind: input, shape index: {}]   ;;  %s617_s3 = inlined_call_operand.vmem [shape: f32[1,128], index: 3, kind: input, shape index: {}]   ;;  %s618_s4 = inlined_call_operand.hbm [shape: f32[1,8,128], index: 4, kind: output, shape index: {0}]   ;;  %s619_s5 = inlined_call_operand.hbm [shape: f32[1,8,128], index: 5, kind: output, shape index: {1}]  }
   0x1   :  { %v431_v0 = vld [vmem:[%s616_s2 + $0x8] sm:$0xff]   ;;  %v432_v1 = vld [vmem:[%s616_s2] sm:$0xff]  }
   0x2   :  { %417 = vmatprep.subr.bf16.mxu0 %v431_v0  ;;  %v433_v2 = vld [vmem:[%s614_s0] sm:$0xff]  }
   0x3   :  { %418 = vmatpush3.bf16.msra.mxu0 %v431_v0  ;;  %421 = vmatprep.mubr.msk.bf16.mxu0 %vm116_vm0, %v433_v2 }
   0x4   :  { %419 = vmatprep.subr.bf16.mxu0 %v432_v1 }
   0x5   :  { %12 = vsyncpa [#allocation8], 0  ;;  %v434_v3 = vld [vmem:[%s614_s0 + $0x8] sm:$0xff]   ;;  %v495_v4 = vmov 0   ;;  %vm72_vm4 = vcmask 0   ;;  %v200_v7 = vld [vmem:[%s615_s1 + $0x10] sm:$0xff]  ;;  %v230_v55 = vlaneseq }
   0x6   :  { %430 = vset.pattern.permute.xlu1 %v495_v4  ;;  %429 = vset.pattern.permute.xlu0 %v495_v4  ;;  %v199_v5 = vld [vmem:[%s615_s1 + $0x8] sm:$0xff]  ;;  %v496_v8 = vmov 0.0   ;;  %vm262_vm5 = vcmp.ge.s32.totalorder %v200_v7, 0  ;;  %vm266_vm6 = vcmp.lt.s32.totalorder %v200_v7, 128  ;;  %vm293_vm8 = vcmask 7168   ;;  %v198_v11 = vld [vmem:[%s615_s1] sm:$0xff] }
   0x7   :  { %420 = vmatpush3.bf16.msra.mxu0 %v432_v1  ;;  %vm261_vm1 = vcmp.ge.s32.totalorder %v199_v5, 0  ;;  %vm265_vm2 = vcmp.lt.s32.totalorder %v199_v5, 128  ;;  %74 = vst.msk [vmem:[#allocation4] sm:$0x1] %vm72_vm4, %v496_v8  ;;  %73 = vst.msk [vmem:[#allocation3] sm:$0x1] %vm72_vm4, %v496_v8 }
   0x8   :  { %vm544_vm3 = vmand %vm261_vm1, %vm265_vm2  ;;  %vm260_vm9 = vcmp.ge.s32.totalorder %v198_v11, 0  ;;  %vm264_vm10 = vcmp.lt.s32.totalorder %v198_v11, 128  ;;  %v201_v16 = vld [vmem:[%s615_s1 + $0x18] sm:$0xff]  ;;  %v406_v33 = vld [vmem:[%s617_s3] ss:$0 sm:$0xff]  ;;  %v231_v59 = vand.u32 127, %v230_v55 }
   0x9   :  { %vm553_vm7 = vmand %vm262_vm5, %vm266_vm6  ;;  %v408_v10 = vsel %vm544_vm3, 1.0, %v496_v8  ;;  %vm263_vm12 = vcmp.ge.s32.totalorder %v201_v16, 0  ;;  %vm267_vm13 = vcmp.lt.s32.totalorder %v201_v16, 128  ;;  %s497_s3 = smov [#allocation7]  }
   0xa   :  { %422 = vmatmul.mubr.msk.bf16.vlgmr.msra.gmra.mxu0 %vm116_vm0, %v434_v3  ;;  %v409_v12 = vsel %vm553_vm7, 1.0, %v496_v8  ;;  %v320_v13 = vsel %vm293_vm8, %v408_v10, 0.0  ;;  %vm565_vm11 = vmand %vm260_vm9, %vm264_vm10  ;;  %s376_s8 = sshll.u32 %s497_s3, 4  ;;  %s377_s8 = int_to_ptr.vmem [resolvable:$true] %s376_s8 }
   0xb   :  { %v407_v15 = vsel %vm565_vm11, 1.0, %v496_v8  ;;  %v322_v17 = vsel %vm293_vm8, %v409_v12, 0.0  ;;  %vm576_vm14 = vmand %vm263_vm12, %vm267_vm13  ;;  %s451_s9 = scalar_lea.vmem %s377_s8, 128  ;;  %p456_p1 = scmp.lt.s32.totalorder %s377_s8, %s377_s8 }
   0xc   :  { %v319_v18 = vsel %vm293_vm8, %v407_v15, 0.0  ;;  %v410_v21 = vsel %vm576_vm14, 1.0, %v496_v8  ;;  %p452_p0 = scmp.ne.s32.totalorder %s377_s8, %s451_s9  ;;  %p457_p2 = scmp.lt.s32.totalorder %s451_s9, %s451_s9 }
   0xd   :  { %v321_v19 = vadd.f32 %v320_v13, %v319_v18  ;;  %v324_v23 = vsel %vm293_vm8, %v410_v21, 0.0 }
   0xe   :  { %v310_v30 = vld [vmem:[#allocation4] sm:$0x1]  ;;  %p458_p3 = por %p457_p2, %p456_p1 }
   0xf   :  { %v323_v22 = vadd.f32 %v322_v17, %v321_v19 }
  0x10   :  { %p459_p4 = pnand %p458_p3, %p452_p0 }
  0x11   :  { %v325_v24 = vadd.f32 %v324_v23, %v323_v22 }
  0x13   :  { %v326_v25 = vrot.slane %v325_v24, 4 }
  0x15   :  { %v327_v26 = vadd.f32 %v326_v25, %v325_v24 }
  0x17   :  { %v328_v27 = vrot.slane %v327_v26, 2 }
  0x19   :  { %v329_v28 = vadd.f32 %v328_v27, %v327_v26 }
  0x1b   :  { %v330_v29 = vrot.slane %v329_v28, 1 }
  0x1d   :  { %v331_v31 = vadd.f32 %v330_v29, %v329_v28 }
  0x1f   :  { %v332_v32 = vadd.f32 %v331_v31, %v310_v30 }
  0x21   :  { %333 = vst.msk [vmem:[#allocation4] sm:$0x1] %vm72_vm4, %v332_v32 }
  0x28   :  { %v412_v4 = vld [vmem:[#allocation4] ss:$0 sm:$0xff] }
  0xca   :  { %v423_v34 = vpop.f32.mrf.mxu0 }
  0xcb   :  { %v196_v35 = vadd.f32 %v423_v34, %v406_v33 }
  0xcc   :  { %v157_v36 = vpop.f32.mrf.mxu0 }
  0xcd   :  { %v194_v37 = vadd.f32 %v406_v33, %v157_v36  ;;  %206 = vmax.xlane.f32.xlu1 %v196_v35 }
  0xce   :  { %v424_v38 = vpop.f32.mrf.mxu0 }
  0xcf   :  { %v197_v39 = vadd.f32 %v424_v38, %v406_v33  ;;  %202 = vmax.xlane.f32.xlu0 %v194_v37 }
  0xd0   :  { %v160_v40 = vpop.f32.mrf.mxu0 }
  0xd1   :  { %v195_v41 = vadd.f32 %v406_v33, %v160_v40  ;;  %208 = vmax.xlane.f32.xlu1 %v197_v39 }
  0xd3   :  { %204 = vmax.xlane.f32.xlu0 %v195_v41 }
  0xe2   :  { %236 = vperm.xlu1 %430, %v199_v5  }
  0xe6   :  { %239 = vperm.xlu1 %430, %v200_v7  }
  0xe9   :  { %233 = vperm.xlu0 %429, %v198_v11  }
  0xea   :  { %242 = vperm.xlu1 %430, %v201_v16  }
 0x156   :  { %v587_v42 = vpop.xlane.xlu1 %206 }
 0x157   :  { %v212_v43 = vsub.f32 %v196_v35, %v587_v42 }
 0x158   :  { %v203_v44 = vpop.xlane.xlu0 %202 }
 0x159   :  { %v210_v45 = vsub.f32 %v194_v37, %v203_v44  ;;  %v218_v48 = vmul.f32 1.442695, %v212_v43 }
 0x15a   :  { %v590_v46 = vpop.xlane.xlu1 %208 }
 0x15b   :  { %v214_v47 = vmul.f32 1.442695, %v210_v45  ;;  %v213_v50 = vsub.f32 %v197_v39, %v590_v46 }
 0x15c   :  { %v205_v49 = vpop.xlane.xlu0 %204 }
 0x15d   :  { %435 = vpow2.f32 %v214_v47  ;;  %v211_v51 = vsub.f32 %v195_v41, %v205_v49  ;;  %v220_v53 = vmul.f32 1.442695, %v213_v50  ;;  %v292_v47 = vld [vmem:[#allocation3] sm:$0x1] }
 0x15e   :  { %437 = vpow2.f32 %v218_v48  ;;  %v237_v54 = vpop.permute.xlu1 %236 }
 0x15f   :  { %v216_v52 = vmul.f32 1.442695, %v211_v51  ;;  %vm245_vm1 = vcmp.eq.s32.totalorder %v231_v59, %v237_v54 }
 0x160   :  { %v249_v2 = vsel %vm245_vm1, %v195_v41, 0.0 }
 0x161   :  { %439 = vpow2.f32 %v216_v52 }
 0x162   :  { %441 = vpow2.f32 %v220_v53  ;;  %v240_v57 = vpop.permute.xlu1 %239 }
 0x163   :  { %vm246_vm15 = vcmp.eq.s32.totalorder %v231_v59, %v240_v57 }
 0x164   :  { %v234_v61 = vpop.permute.xlu0 %233  ;;  %v250_v63 = vsel %vm246_vm15, %v196_v35, 0.0 }
 0x165   :  { %vm244_vm0 = vcmp.eq.s32.totalorder %v231_v59, %v234_v61 }
 0x166   :  { %v248_v0 = vsel %vm244_vm0, %v194_v37, 0.0  ;;  %v243_v1 = vpop.permute.xlu1 %242 }
 0x167   :  { %vm247_vm2 = vcmp.eq.s32.totalorder %v231_v59, %v243_v1 }
 0x168   :  { %v251_v3 = vsel %vm247_vm2, %v197_v39, 0.0 }
 0x16a   :  { %v436_v56 = vpop.eup %435 }
 0x16b   :  { %222 = vadd.xlane.f32.xlu1 %v436_v56  ;;  %v438_v58 = vpop.eup %437 }
 0x16e   :  { %v440_v60 = vpop.eup %439 }
 0x16f   :  { %226 = vadd.xlane.f32.xlu1 %v438_v58  ;;  %224 = vadd.xlane.f32.xlu0 %v440_v60  ;;  %v442_v62 = vpop.eup %441 }
 0x173   :  { %228 = vadd.xlane.f32.xlu1 %v442_v62  ;;  %256 = vadd.xlane.f32.xlu0 %v250_v63 }
 0x177   :  { %252 = vadd.xlane.f32.xlu1 %v248_v0 }
 0x17b   :  { %254 = vadd.xlane.f32.xlu1 %v249_v2 }
 0x17f   :  { %258 = vadd.xlane.f32.xlu1 %v251_v3 }
 0x190   :  { %355 = vperm.xlu1 %430, %v412_v4  }
 0x1f4   :  { %v223_v5 = vpop.xlane.xlu1 %222 }
 0x1f5   :  { %443 = vlog2.f32 %v223_v5 }
 0x1f8   :  { %v227_v7 = vpop.xlane.xlu1 %226  ;;  %v225_v8 = vpop.xlane.xlu0 %224 }
 0x1f9   :  { %445 = vlog2.f32 %v227_v7 }
 0x1fa   :  { %447 = vlog2.f32 %v225_v8 }
 0x1fc   :  { %v229_v10 = vpop.xlane.xlu1 %228  ;;  %v257_v26 = vpop.xlane.xlu0 %256 }
 0x1fd   :  { %449 = vlog2.f32 %v229_v10 }
 0x200   :  { %v253_v11 = vpop.xlane.xlu1 %252 }
 0x202   :  { %v444_v12 = vpop.eup %443 }
 0x203   :  { %v273_v13 = vmul.f32 0.6931472, %v444_v12 }
 0x204   :  { %v255_v15 = vpop.xlane.xlu1 %254 }
 0x205   :  { %v280_v16 = vadd.f32 %v273_v13, %v203_v44 }
 0x206   :  { %v446_v17 = vpop.eup %445 }
 0x207   :  { %v448_v18 = vpop.eup %447  ;;  %v277_v19 = vmul.f32 0.6931472, %v446_v17  ;;  %v284_v22 = vsub.f32 %v280_v16, %v253_v11 }
 0x208   :  { %v275_v21 = vmul.f32 0.6931472, %v448_v18  ;;  %v259_v23 = vpop.xlane.xlu1 %258 }
 0x209   :  { %v282_v24 = vadd.f32 %v277_v19, %v587_v42  ;;  %v288_v30 = vsel %vm565_vm11, %v284_v22, 0.0 }
 0x20a   :  { %v450_v25 = vpop.eup %449  ;;  %v281_v27 = vadd.f32 %v275_v21, %v205_v49  ;;  %v294_v36 = vsel %vm293_vm8, %v288_v30, 0.0 }
 0x20b   :  { %v279_v28 = vmul.f32 0.6931472, %v450_v25  ;;  %v286_v29 = vsub.f32 %v282_v24, %v257_v26 }
 0x20c   :  { %v285_v31 = vsub.f32 %v281_v27, %v255_v15  ;;  %v356_v32 = vpop.permute.xlu1 %355 }
 0x20d   :  { %v283_v33 = vadd.f32 %v279_v28, %v590_v46  ;;  %359 = vst [vmem:[#allocation7] sm:$0xff] %v356_v32  ;;  %v290_v34 = vsel %vm553_vm7, %v286_v29, 0.0 }
 0x20e   :  { %v289_v35 = vsel %vm544_vm3, %v285_v31, 0.0  ;;  %v297_v14 = vsel %vm293_vm8, %v290_v34, 0.0 }
 0x20f   :  { %v295_v37 = vsel %vm293_vm8, %v289_v35, 0.0  ;;  %v287_v38 = vsub.f32 %v283_v33, %v259_v23 }
 0x210   :  { %v296_v39 = vadd.f32 %v295_v37, %v294_v36 }
 0x211   :  { %v291_v40 = vsel %vm576_vm14, %v287_v38, 0.0 }
 0x212   :  { %v298_v41 = vadd.f32 %v297_v14, %v296_v39  ;;  %v299_v42 = vsel %vm293_vm8, %v291_v40, 0.0 }
 0x214   :  { %v300_v43 = vadd.f32 %v299_v42, %v298_v41 }
 0x216   :  { %v301_v9 = vrot.slane %v300_v43, 4 }
 0x218   :  { %v302_v44 = vadd.f32 %v301_v9, %v300_v43 }
 0x21a   :  { %v303_v45 = vrot.slane %v302_v44, 2 }
 0x21c   :  { %v304_v6 = vadd.f32 %v303_v45, %v302_v44 }
 0x21e   :  { %v305_v46 = vrot.slane %v304_v6, 1 }
 0x220   :  { %v306_v48 = vadd.f32 %v305_v46, %v304_v6 }
 0x222   :  { %v307_v49 = vadd.f32 %v306_v48, %v292_v47 }
 0x224   :  { %309 = vst.msk [vmem:[#allocation3] sm:$0x1] %vm72_vm4, %v307_v49 }
 0x225   :  { %462 = shalt.err (!%p459_p4)
}
 0x226   :  { %379 = dma.vmem_to_hbm [thread:$0]  %s377_s8, 128, %s619_s5, [#allocation8]  }
 0x227   :  { %s498_s12 = smov [#allocation5]  }
 0x228   :  { %s366_s13 = sshll.u32 %s498_s12, 4  ;;  %s367_s13 = int_to_ptr.vmem [resolvable:$true] %s366_s13 }
 0x229   :  { %s471_s14 = scalar_lea.vmem %s367_s13, 128  ;;  %p476_p6 = scmp.lt.s32.totalorder %s367_s13, %s367_s13 }
 0x22a   :  { %p472_p5 = scmp.ne.s32.totalorder %s367_s13, %s471_s14  ;;  %p477_p7 = scmp.lt.s32.totalorder %s471_s14, %s471_s14 }
 0x22b   :  { %v411_v20 = vld [vmem:[#allocation3] ss:$0 sm:$0xff] }
 0x22c   :  { %343 = vperm.xlu0 %429, %v411_v20   ;;  %p478_p8 = por %p477_p7, %p476_p6 }
 0x22e   :  { %p479_p9 = pnand %p478_p8, %p472_p5 }
 0x2a7   :  { %v344_v50 = vpop.permute.xlu0 %343 }
 0x2a8   :  { %347 = vst [vmem:[#allocation5] sm:$0xff] %v344_v50 }
 0x2a9   :  { %482 = shalt.err (!%p479_p9)
}
 0x2aa   :  { %369 = dma.vmem_to_hbm [thread:$0]  %s367_s13, 128, %s618_s4, [#allocation6]  }
 0x2ab   :  { %491 = dma.done.wait [#allocation6], 128  }
 0x2ac   :  { %492 = vsyncadd [#allocation6], 4294967168 }
 0x2ad   :  { %493 = dma.done.wait [#allocation8], 128  }
 0x2ae   :  { %494 = vsyncadd [#allocation8], 4294967168 }
 0x2af   :  { %386 = vsyncpa [#allocation6], 1 }
 0x2b0   :  { %387 = vsyncpa [#allocation8], 1 }

</bundles_post_ra>
